<compile_context>
chip_gen: v6e
topology: v6e:2x2x1
jax: 0.10.0
libtpu: 0.0.40
codegen_flags: <defaults>
</compile_context>

<pallas_src>
import functools

import jax
import jax.numpy as jnp
from jax.experimental import pallas as pl
from jax.experimental.pallas import tpu as pltpu

NEG_SLOPE = 0.01              # torch.nn.LeakyReLU default
BN_EPS = 1e-5
FUSED_MAX_NODES = 2048        # padded-node threshold for the fully fused path
VMEM_LIMIT_FUSED = 32 * 1024 * 1024   # safe on v5e/v6e/v7x
VMEM_LIMIT_TILED = 48 * 1024 * 1024   # resident-h headroom; still < v7x 64 MiB physical


def _round_up(x, m):
    return ((x + m - 1) // m) * m


def _pad2d(a, rows, cols, dtype):
    out = jnp.zeros((rows, cols), dtype)
    return out.at[: a.shape[0], : a.shape[1]].set(a.astype(dtype))


# ---------------------------------------------------------------------------
# Kernels
# ---------------------------------------------------------------------------
def _fused_kernel(a_ref, h0_ref, w_ref, b_ref, p_ref, wl_ref, bl_ref, o_ref,
                  hbuf0, hbuf1, *, n_layers):
    """All layers + readout fused; A_hat / weights / pool resident in VMEM."""
    bufs = (hbuf0, hbuf1)
    cur = h0_ref
    for l in range(n_layers):                      # static unroll (n_layers is small)
        dst = bufs[l % 2]
        # Aggregation: bf16 MXU, f32 accumulation.
        agg = jnp.dot(a_ref[...], cur[...], preferred_element_type=jnp.float32)
        # Transform (BN folded) in f32, then LeakyReLU; store bf16 for the next layer.
        z = jnp.dot(agg, w_ref[l], preferred_element_type=jnp.float32) + b_ref[l]
        dst[...] = jnp.where(z >= 0.0, z, NEG_SLOPE * z).astype(dst.dtype)
        cur = dst
    pooled = jnp.dot(p_ref[...], cur[...], preferred_element_type=jnp.float32)
    o_ref[...] = (jnp.dot(pooled, wl_ref[...], preferred_element_type=jnp.float32)
                  + bl_ref[...]).astype(o_ref.dtype)


def _gcn_layer_kernel(ids_ref, cnt_ref, a_ref, h_ref, w_ref, b_ref, o_ref, acc_ref,
                      *, tk, nb_c):
    """Row tile i of one GCN layer, block-sparse over the column (reduction) axis.

    o[i] = LeakyReLU((sum_{k in nnz blocks} A[i,k] @ h[k]) @ W' + b')
    h is fully VMEM-resident; the k-chunk is sliced in-kernel from the block id.
    """
    i = pl.program_id(0)
    k = pl.program_id(1)

    @pl.when(k == 0)
    def _():
        acc_ref[...] = jnp.zeros_like(acc_ref)

    @pl.when(k < cnt_ref[i])                       # skip all-zero adjacency blocks
    def _():
        blk = ids_ref[i * nb_c + k]
        off = pl.multiple_of(blk * tk, tk)
        acc_ref[...] += jnp.dot(a_ref[...], h_ref[pl.ds(off, tk), :],
                                preferred_element_type=jnp.float32)

    @pl.when(k == pl.num_programs(1) - 1)
    def _():
        # Feature transform with BN folded in (f32 acc x f32 W'), then LeakyReLU.
        z = jnp.dot(acc_ref[...], w_ref[...], preferred_element_type=jnp.float32) + b_ref[...]
        o_ref[...] = jnp.where(z >= 0.0, z, NEG_SLOPE * z).astype(o_ref.dtype)


def _readout_kernel(p_ref, h_ref, w_ref, b_ref, o_ref, acc_ref):
    """out = (sum_k P[:,k] @ h[k]) @ W_lin + b_lin   (global_add_pool + Linear)."""
    k = pl.program_id(0)
    part = jnp.dot(p_ref[...], h_ref[...], preferred_element_type=jnp.float32)

    @pl.when(k == 0)
    def _():
        acc_ref[...] = part                        # direct write, no zero-fill pass

    @pl.when(k > 0)
    def _():
        acc_ref[...] += part

    @pl.when(k == pl.num_programs(0) - 1)
    def _():
        o_ref[...] = (jnp.dot(acc_ref[...], w_ref[...], preferred_element_type=jnp.float32)
                      + b_ref[...]).astype(o_ref.dtype)


# ---------------------------------------------------------------------------
# pallas_call wrappers
# ---------------------------------------------------------------------------
def _fused_forward(a_hat, h0, w_stack, b_stack, pool, w_lin, b_lin, *, n_layers):
    n_pad, c_pad = h0.shape
    g_pad = pool.shape[0]
    o_pad = w_lin.shape[1]
    vspec = pl.BlockSpec(memory_space=pltpu.MemorySpace.VMEM)
    return pl.pallas_call(
        functools.partial(_fused_kernel, n_layers=n_layers),
        out_shape=jax.ShapeDtypeStruct((g_pad, o_pad), jnp.float32),
        in_specs=[vspec] * 7,
        out_specs=vspec,
        scratch_shapes=[pltpu.VMEM((n_pad, c_pad), jnp.bfloat16),
                        pltpu.VMEM((n_pad, c_pad), jnp.bfloat16)],
        compiler_params=pltpu.CompilerParams(vmem_limit_bytes=VMEM_LIMIT_FUSED),
    )(a_hat, h0, w_stack, b_stack, pool, w_lin, b_lin)


def _block_table(a_hat_p, tm, tk):
    """Per row tile: count + column-block ids of nonzero A_hat blocks (tail repeats the
    last valid id so Pallas does not re-DMA anything for skipped steps)."""
    n_pad = a_hat_p.shape[0]
    nb_r, nb_c = n_pad // tm, n_pad // tk
    nz = (a_hat_p.reshape(nb_r, tm, nb_c, tk) != 0).any(axis=(1, 3))        # (nb_r, nb_c)
    cnt = nz.sum(axis=1).astype(jnp.int32)
    order = jnp.argsort(jnp.logical_not(nz).astype(jnp.int32),
                        axis=1, stable=True).astype(jnp.int32)              # nnz blocks first
    last = jnp.take_along_axis(order, jnp.maximum(cnt - 1, 0)[:, None], axis=1)
    pos = jnp.arange(nb_c, dtype=jnp.int32)[None, :]
    ids = jnp.where(pos < cnt[:, None], order, last).astype(jnp.int32)
    return ids.reshape(-1), cnt


def _gcn_layer(blk_ids, blk_cnt, a_hat, h, w, b, *, tm, tk):
    n_pad = a_hat.shape[0]
    c_pad = h.shape[1]
    nb_c = n_pad // tk
    grid = (n_pad // tm, nb_c)
    return pl.pallas_call(
        functools.partial(_gcn_layer_kernel, tk=tk, nb_c=nb_c),
        out_shape=jax.ShapeDtypeStruct((n_pad, c_pad), jnp.bfloat16),
        grid_spec=pltpu.PrefetchScalarGridSpec(
            num_scalar_prefetch=2,
            grid=grid,
            in_specs=[
                # A_hat: stream only the nonzero (i, k) blocks (scalar-prefetch ids).
                pl.BlockSpec((tm, tk), lambda i, k, ids, cnt: (i, ids[i * nb_c + k])),
                # h: fully VMEM-resident (constant index_map -> single DMA), sliced in-kernel.
                pl.BlockSpec((n_pad, c_pad), lambda i, k, ids, cnt: (0, 0)),
                pl.BlockSpec((c_pad, c_pad), lambda i, k, ids, cnt: (0, 0)),   # W' resident
                pl.BlockSpec((1, c_pad), lambda i, k, ids, cnt: (0, 0)),       # b' resident
            ],
            out_specs=pl.BlockSpec((tm, c_pad), lambda i, k, ids, cnt: (i, 0)),
            scratch_shapes=[pltpu.VMEM((tm, c_pad), jnp.float32)],
        ),
        compiler_params=pltpu.CompilerParams(
            dimension_semantics=("parallel", "arbitrary"),
            vmem_limit_bytes=VMEM_LIMIT_TILED,
        ),
    )(blk_ids, blk_cnt, a_hat, h, w, b)


def _readout(pool, h, w_lin, b_lin, *, tk):
    n_pad, c_pad = h.shape
    g_pad = pool.shape[0]
    o_pad = w_lin.shape[1]
    return pl.pallas_call(
        _readout_kernel,
        out_shape=jax.ShapeDtypeStruct((g_pad, o_pad), jnp.float32),
        grid_spec=pltpu.PrefetchScalarGridSpec(
            num_scalar_prefetch=0,
            grid=(n_pad // tk,),
            in_specs=[
                pl.BlockSpec((g_pad, tk), lambda k: (0, k)),      # pooling matrix tile
                pl.BlockSpec((tk, c_pad), lambda k: (k, 0)),      # h row tile
                pl.BlockSpec((c_pad, o_pad), lambda k: (0, 0)),   # W_lin resident
                pl.BlockSpec((1, o_pad), lambda k: (0, 0)),       # b_lin resident
            ],
            out_specs=pl.BlockSpec((g_pad, o_pad), lambda k: (0, 0)),
            scratch_shapes=[pltpu.VMEM((g_pad, c_pad), jnp.float32)],
        ),
        compiler_params=pltpu.CompilerParams(
            dimension_semantics=("arbitrary",),
            vmem_limit_bytes=VMEM_LIMIT_TILED,
        ),
    )(pool, h, w_lin, b_lin)


# ---------------------------------------------------------------------------
# Forward pass
# ---------------------------------------------------------------------------
def gnn_forward(x, edge_index, batch, params, *, num_graphs, n_layers=None,
                force_tiled=False, tile=None):
    n_nodes, in_ch = x.shape
    hid_ch = params["layers"][0][0].shape[1]
    out_ch = params["lin_w"].shape[1]
    if n_layers is None:
        n_layers = len(params["layers"])

    c_pad = max(128, _round_up(max(in_ch, hid_ch), 128))       # lane-dense channels
    o_pad = max(128, _round_up(out_ch, 128))                   # lane-dense output slab
    g_pad = _round_up(max(num_graphs, 16), 16)                 # bf16 sublane-pack friendly

    use_fused = (not force_tiled) and (_round_up(n_nodes, 128) <= FUSED_MAX_NODES)
    if tile is None:
        # Tiled path only kicks in for large graphs -> 512 tiles (HBM-roofline sweet spot)
        # and >= 2 row blocks so both v7x TensorCores get work on the parallel axis.
        tile = 128 if use_fused else 512
    n_pad = _round_up(n_nodes, 128 if use_fused else tile)

    # --- A_hat = D^-1/2 (A + I) D^-1/2 built directly into its padded buffer. -----------
    # PyG gcn_norm semantics: deg over targets incl. self-loop; scatter-ADD keeps edge
    # multiplicity. (Cache a_hat_p across calls when the graph is static.)
    src, dst = edge_index[0], edge_index[1]
    deg = jnp.zeros((n_nodes,), jnp.float32).at[dst].add(1.0) + 1.0
    d_inv_sqrt = 1.0 / jnp.sqrt(deg)
    a = jnp.zeros((n_pad, n_pad), jnp.float32)
    a = a.at[dst, src].add(d_inv_sqrt[dst] * d_inv_sqrt[src])
    node_idx = jnp.arange(n_nodes)
    a = a.at[node_idx, node_idx].add(d_inv_sqrt * d_inv_sqrt)   # self-loops
    a_hat_p = a.astype(jnp.bfloat16)

    h0 = _pad2d(x, n_pad, c_pad, jnp.bfloat16)

    # One-hot pooling matrix: P[g, n] = 1 iff node n belongs to graph g.
    pool = (batch[None, :] == jnp.arange(num_graphs, dtype=batch.dtype)[:, None]
            ).astype(jnp.float32)
    pool_p = _pad2d(pool, g_pad, n_pad, jnp.bfloat16)

    # Fold eval-mode BatchNorm (running stats read from params) into W'/b'; keep f32.
    ws, bs = [], []
    for (w, b, gamma, beta, run_mean, run_var) in params["layers"]:
        scale = gamma / jnp.sqrt(run_var + BN_EPS)
        ws.append(_pad2d(w * scale[None, :], c_pad, c_pad, jnp.float32))
        bs.append(_pad2d(((b - run_mean) * scale + beta).reshape(1, -1), 1, c_pad,
                         jnp.float32))
    wl_p = _pad2d(params["lin_w"], c_pad, o_pad, jnp.float32)
    bl_p = _pad2d(params["lin_b"].reshape(1, -1), 1, o_pad, jnp.float32)

    if use_fused:
        out_pad = _fused_forward(a_hat_p, h0, jnp.stack(ws), jnp.stack(bs),
                                 pool_p, wl_p, bl_p, n_layers=n_layers)
    else:
        blk_ids, blk_cnt = _block_table(a_hat_p, tile, tile)
        h = h0
        for w_p, b_p in zip(ws, bs):
            h = _gcn_layer(blk_ids, blk_cnt, a_hat_p, h, w_p, b_p, tm=tile, tk=tile)
        out_pad = _readout(pool_p, h, wl_p, bl_p, tk=tile)

    return out_pad[:num_graphs, :out_ch]


# ---------------------------------------------------------------------------
# Demo / self-check
# ---------------------------------------------------------------------------
def _chain_graph_edges(start, n):
    s = jnp.arange(start, start + n - 1, dtype=jnp.int32)
    return s, s + 1


if __name__ == "__main__":
    # Config consistent with GNN('GCN', in_channels=8, hidden_channels=32,
    #                             out_channels=4, n_layers=2), eval mode.
    N_NODES, IN_CH, HID_CH, OUT_CH, N_LAYERS, N_GRAPHS = 16, 8, 32, 4, 2, 2

    key = jax.random.PRNGKey(0)
    keys = jax.random.split(key, 4 + 4 * N_LAYERS)

    # Node features.
    x = jax.random.normal(keys[0], (N_NODES, IN_CH), dtype=jnp.float32)

    # Two chain graphs: nodes 0..7 (graph 0) and 8..15 (graph 1), undirected edges.
    s0, d0 = _chain_graph_edges(0, 8)
    s1, d1 = _chain_graph_edges(8, 8)
    src = jnp.concatenate([s0, s1])
    dst = jnp.concatenate([d0, d1])
    edge_index = jnp.stack([jnp.concatenate([src, dst]), jnp.concatenate([dst, src])])
    batch = jnp.concatenate([jnp.zeros(8, jnp.int32), jnp.ones(8, jnp.int32)])

    # Deterministic parameters (per layer: W, b, BN gamma/beta + running stats).
    layer_params = []
    for i in range(N_LAYERS):
        fan_in = IN_CH if i == 0 else HID_CH
        w = 0.1 * jax.random.normal(keys[1 + 4 * i], (fan_in, HID_CH), jnp.float32)
        b = 0.1 * jax.random.normal(keys[2 + 4 * i], (HID_CH,), jnp.float32)
        gamma = 1.0 + 0.05 * jax.random.normal(keys[3 + 4 * i], (HID_CH,), jnp.float32)
        beta = 0.05 * jax.random.normal(keys[4 + 4 * i], (HID_CH,), jnp.float32)
        run_mean = jnp.zeros((HID_CH,), jnp.float32)      # fresh-BN running statistics
        run_var = jnp.ones((HID_CH,), jnp.float32)
        layer_params.append((w, b, gamma, beta, run_mean, run_var))

    lin_w = 0.1 * jax.random.normal(keys[-2], (HID_CH, OUT_CH), jnp.float32)
    lin_b = 0.1 * jax.random.normal(keys[-1], (OUT_CH,), jnp.float32)
    params = {"layers": layer_params, "lin_w": lin_w, "lin_b": lin_b}

    # Primary run (small graph -> fused single-kernel path).
    out = gnn_forward(x, edge_index, batch, params, num_graphs=N_GRAPHS)
    jax.block_until_ready(out)
    assert out.shape == (N_GRAPHS, OUT_CH), out.shape
    assert out.dtype == jnp.float32
    assert bool(jnp.isfinite(out).all())

    # Cross-check: larger batch (2 chains x 150 nodes) exercising the tiled,
    # block-sparse scalar-prefetch path vs the fused path.
    n_big = 300
    x2 = jax.random.normal(jax.random.PRNGKey(1), (n_big, IN_CH), dtype=jnp.float32)
    s0, d0 = _chain_graph_edges(0, 150)
    s1, d1 = _chain_graph_edges(150, 150)
    src2 = jnp.concatenate([s0, s1])
    dst2 = jnp.concatenate([d0, d1])
    edge_index2 = jnp.stack([jnp.concatenate([src2, dst2]),
                             jnp.concatenate([dst2, src2])])
    batch2 = jnp.concatenate([jnp.zeros(150, jnp.int32), jnp.ones(150, jnp.int32)])

    out_fused = gnn_forward(x2, edge_index2, batch2, params, num_graphs=2)
    out_tiled = gnn_forward(x2, edge_index2, batch2, params, num_graphs=2,
                            force_tiled=True, tile=128)
    jax.block_until_ready((out_fused, out_tiled))
    assert bool(jnp.isfinite(out_tiled).all())
    assert bool(jnp.allclose(out_fused, out_tiled, rtol=5e-2, atol=5e-2)), (
        out_fused, out_tiled)

    print("KERNEL_OK")
</pallas_src>

<mosaic_0001>
module attributes {stable_mosaic.version = 11 : i64} {
  func.func @_fused_kernel(%arg0: memref<128x128xbf16, #tpu.memory_space<vmem>>, %arg1: memref<128x128xbf16, #tpu.memory_space<vmem>>, %arg2: memref<2x128x128xf32, #tpu.memory_space<vmem>>, %arg3: memref<2x1x128xf32, #tpu.memory_space<vmem>>, %arg4: memref<16x128xbf16, #tpu.memory_space<vmem>>, %arg5: memref<128x128xf32, #tpu.memory_space<vmem>>, %arg6: memref<1x128xf32, #tpu.memory_space<vmem>>, %arg7: memref<16x128xf32, #tpu.memory_space<vmem>>, %arg8: memref<128x128xbf16, #tpu.memory_space<vmem>>, %arg9: memref<128x128xbf16, #tpu.memory_space<vmem>>) attributes {dimension_semantics = [], scalar_prefetch = 0 : i64, scratch_operands = 2 : i64, tpu.core_type = #tpu.core_type<tc>} {
    %c0 = arith.constant 0 : index
    %c0_0 = arith.constant 0 : index
    %0 = vector.load %arg0[%c0, %c0_0] : memref<128x128xbf16, #tpu.memory_space<vmem>>, vector<128x128xbf16>
    %c0_1 = arith.constant 0 : index
    %c0_2 = arith.constant 0 : index
    %1 = vector.load %arg1[%c0_1, %c0_2] : memref<128x128xbf16, #tpu.memory_space<vmem>>, vector<128x128xbf16>
    %cst = arith.constant dense<0.000000e+00> : vector<128x128xf32>
    %2 = tpu.matmul %0, %1, %cst {dimension_numbers = #tpu.dot_dimension_numbers<[1], [0], [0], [1], [0, 0, 1, 1], [], []>} : vector<128x128xbf16>, vector<128x128xbf16>, vector<128x128xf32> -> vector<128x128xf32>
    %c0_3 = arith.constant 0 : index
    %c0_4 = arith.constant 0 : index
    %c0_5 = arith.constant 0 : index
    %3 = vector.load %arg2[%c0_3, %c0_4, %c0_5] : memref<2x128x128xf32, #tpu.memory_space<vmem>>, vector<1x128x128xf32>
    %4 = vector.shape_cast %3 : vector<1x128x128xf32> to vector<128x128xf32>
    %cst_6 = arith.constant dense<0.000000e+00> : vector<128x128xf32>
    %5 = tpu.matmul %2, %4, %cst_6 {dimension_numbers = #tpu.dot_dimension_numbers<[1], [0], [0], [1], [0, 0, 1, 1], [], []>} : vector<128x128xf32>, vector<128x128xf32>, vector<128x128xf32> -> vector<128x128xf32>
    %c0_7 = arith.constant 0 : index
    %c0_8 = arith.constant 0 : index
    %c0_9 = arith.constant 0 : index
    %6 = vector.load %arg3[%c0_7, %c0_8, %c0_9] : memref<2x1x128xf32, #tpu.memory_space<vmem>>, vector<1x1x128xf32>
    %7 = vector.shape_cast %6 : vector<1x1x128xf32> to vector<1x128xf32>
    %8 = vector.broadcast %7 : vector<1x128xf32> to vector<128x128xf32>
    %9 = arith.addf %5, %8 : vector<128x128xf32>
    %cst_10 = arith.constant 0.000000e+00 : f32
    %10 = vector.broadcast %cst_10 : f32 to vector<128x128xf32>
    %11 = arith.cmpf oge, %9, %10 : vector<128x128xf32>
    %cst_11 = arith.constant 0.00999999977 : f32
    %12 = vector.broadcast %cst_11 : f32 to vector<128x128xf32>
    %13 = arith.mulf %12, %9 : vector<128x128xf32>
    %14 = arith.select %11, %9, %13 : vector<128x128xi1>, vector<128x128xf32>
    %15 = arith.truncf %14 : vector<128x128xf32> to vector<128x128xbf16>
    %c0_12 = arith.constant 0 : index
    %c0_13 = arith.constant 0 : index
    %16 = vector.load %arg8[%c0_12, %c0_13] : memref<128x128xbf16, #tpu.memory_space<vmem>>, vector<128x128xbf16>
    tpu.vector_store %arg8[%c0_12, %c0_13], %15 {strides = array<i32>} : memref<128x128xbf16, #tpu.memory_space<vmem>>, vector<128x128xbf16>,
    %c0_14 = arith.constant 0 : index
    %c0_15 = arith.constant 0 : index
    %17 = vector.load %arg0[%c0_14, %c0_15] : memref<128x128xbf16, #tpu.memory_space<vmem>>, vector<128x128xbf16>
    %c0_16 = arith.constant 0 : index
    %c0_17 = arith.constant 0 : index
    %18 = vector.load %arg8[%c0_16, %c0_17] : memref<128x128xbf16, #tpu.memory_space<vmem>>, vector<128x128xbf16>
    %cst_18 = arith.constant dense<0.000000e+00> : vector<128x128xf32>
    %19 = tpu.matmul %17, %18, %cst_18 {dimension_numbers = #tpu.dot_dimension_numbers<[1], [0], [0], [1], [0, 0, 1, 1], [], []>} : vector<128x128xbf16>, vector<128x128xbf16>, vector<128x128xf32> -> vector<128x128xf32>
    %c1 = arith.constant 1 : index
    %c0_19 = arith.constant 0 : index
    %c0_20 = arith.constant 0 : index
    %20 = vector.load %arg2[%c1, %c0_19, %c0_20] : memref<2x128x128xf32, #tpu.memory_space<vmem>>, vector<1x128x128xf32>
    %21 = vector.shape_cast %20 : vector<1x128x128xf32> to vector<128x128xf32>
    %cst_21 = arith.constant dense<0.000000e+00> : vector<128x128xf32>
    %22 = tpu.matmul %19, %21, %cst_21 {dimension_numbers = #tpu.dot_dimension_numbers<[1], [0], [0], [1], [0, 0, 1, 1], [], []>} : vector<128x128xf32>, vector<128x128xf32>, vector<128x128xf32> -> vector<128x128xf32>
    %c1_22 = arith.constant 1 : index
    %c0_23 = arith.constant 0 : index
    %c0_24 = arith.constant 0 : index
    %23 = vector.load %arg3[%c1_22, %c0_23, %c0_24] : memref<2x1x128xf32, #tpu.memory_space<vmem>>, vector<1x1x128xf32>
    %24 = vector.shape_cast %23 : vector<1x1x128xf32> to vector<1x128xf32>
    %25 = vector.broadcast %24 : vector<1x128xf32> to vector<128x128xf32>
    %26 = arith.addf %22, %25 : vector<128x128xf32>
    %cst_25 = arith.constant 0.000000e+00 : f32
    %27 = vector.broadcast %cst_25 : f32 to vector<128x128xf32>
    %28 = arith.cmpf oge, %26, %27 : vector<128x128xf32>
    %cst_26 = arith.constant 0.00999999977 : f32
    %29 = vector.broadcast %cst_26 : f32 to vector<128x128xf32>
    %30 = arith.mulf %29, %26 : vector<128x128xf32>
    %31 = arith.select %28, %26, %30 : vector<128x128xi1>, vector<128x128xf32>
    %32 = arith.truncf %31 : vector<128x128xf32> to vector<128x128xbf16>
    %c0_27 = arith.constant 0 : index
    %c0_28 = arith.constant 0 : index
    %33 = vector.load %arg9[%c0_27, %c0_28] : memref<128x128xbf16, #tpu.memory_space<vmem>>, vector<128x128xbf16>
    tpu.vector_store %arg9[%c0_27, %c0_28], %32 {strides = array<i32>} : memref<128x128xbf16, #tpu.memory_space<vmem>>, vector<128x128xbf16>,
    %c0_29 = arith.constant 0 : index
    %c0_30 = arith.constant 0 : index
    %34 = vector.load %arg4[%c0_29, %c0_30] : memref<16x128xbf16, #tpu.memory_space<vmem>>, vector<16x128xbf16>
    %c0_31 = arith.constant 0 : index
    %c0_32 = arith.constant 0 : index
    %35 = vector.load %arg9[%c0_31, %c0_32] : memref<128x128xbf16, #tpu.memory_space<vmem>>, vector<128x128xbf16>
    %cst_33 = arith.constant dense<0.000000e+00> : vector<16x128xf32>
    %36 = tpu.matmul %34, %35, %cst_33 {dimension_numbers = #tpu.dot_dimension_numbers<[1], [0], [0], [1], [0, 0, 1, 1], [], []>} : vector<16x128xbf16>, vector<128x128xbf16>, vector<16x128xf32> -> vector<16x128xf32>
    %c0_34 = arith.constant 0 : index
    %c0_35 = arith.constant 0 : index
    %37 = vector.load %arg5[%c0_34, %c0_35] : memref<128x128xf32, #tpu.memory_space<vmem>>, vector<128x128xf32>
    %cst_36 = arith.constant dense<0.000000e+00> : vector<16x128xf32>
    %38 = tpu.matmul %36, %37, %cst_36 {dimension_numbers = #tpu.dot_dimension_numbers<[1], [0], [0], [1], [0, 0, 1, 1], [], []>} : vector<16x128xf32>, vector<128x128xf32>, vector<16x128xf32> -> vector<16x128xf32>
    %c0_37 = arith.constant 0 : index
    %c0_38 = arith.constant 0 : index
    %39 = vector.load %arg6[%c0_37, %c0_38] : memref<1x128xf32, #tpu.memory_space<vmem>>, vector<1x128xf32>
    %40 = vector.broadcast %39 : vector<1x128xf32> to vector<16x128xf32>
    %41 = arith.addf %38, %40 : vector<16x128xf32>
    %c0_39 = arith.constant 0 : index
    %c0_40 = arith.constant 0 : index
    %42 = vector.load %arg7[%c0_39, %c0_40] : memref<16x128xf32, #tpu.memory_space<vmem>>, vector<16x128xf32>
    tpu.vector_store %arg7[%c0_39, %c0_40], %41 {strides = array<i32>} : memref<16x128xf32, #tpu.memory_space<vmem>>, vector<16x128xf32>,
    return
  }
}

</mosaic_0001>

<bundles_post_ra>
// kernel: tpu_custom_call.1
= control target key start
LH: loop header
LB: loop body
LE: loop exit
PB: predicated region body
PF: predicated region fallthrough
CT: control target
= control target key end

     0   :  { %12 = vsyncpa [#allocation5], 0  ;;  %s2243_s0 = inlined_call_operand.hbm [shape: bf16[128,128], index: 0, kind: input, shape index: {}]   ;;  %s2244_s1 = inlined_call_operand.hbm [shape: bf16[128,128], index: 1, kind: input, shape index: {}]   ;;  %s2245_s2 = inlined_call_operand.hbm [shape: f32[2,128,128], index: 2, kind: input, shape index: {}]   ;;  %s2246_s3 = inlined_call_operand.vmem [shape: f32[2,1,128], index: 3, kind: input, shape index: {}]   ;;  %s2247_s4 = inlined_call_operand.hbm [shape: bf16[16,128], index: 4, kind: input, shape index: {}]   ;;  %s2248_s5 = inlined_call_operand.hbm [shape: f32[128,128], index: 5, kind: input, shape index: {}]   ;;  %s2249_s6 = inlined_call_operand.vmem [shape: f32[1,128], index: 6, kind: input, shape index: {}]   ;;  %s2250_s7 = inlined_call_operand.hbm [shape: f32[16,128], index: 7, kind: output, shape index: {}]  }
   0x1   :  { %13 = vsyncpa [#allocation8], 0 }
   0x2   :  { %14 = vsyncpa [#allocation11], 0 }
   0x3   :  { %15 = vsyncpa [#allocation6], 0  ;;  %s2110_s24 = smov [#allocation7]   ;;  %s2111_s26 = smov [#allocation10]  }
   0x4   :  { %s33_s25 = sshll.u32 %s2110_s24, 4  ;;  %s59_s27 = sshll.u32 %s2111_s26, 4  ;;  %s34_s25 = int_to_ptr.vmem [resolvable:$true] %s33_s25  ;;  %s60_s27 = int_to_ptr.vmem [resolvable:$true] %s59_s27 }
   0x5   :  { %s1990_s28 = scalar_lea.vmem %s34_s25, 1024  ;;  %p1995_p1 = scmp.lt.s32.totalorder %s34_s25, %s34_s25 }
   0x6   :  { %p1991_p0 = scmp.ne.s32.totalorder %s34_s25, %s1990_s28  ;;  %p1996_p2 = scmp.lt.s32.totalorder %s1990_s28, %s1990_s28 }
   0x8   :  { %p1997_p3 = por %p1996_p2, %p1995_p1 }
   0xa   :  { %p1998_p4 = pnand %p1997_p3, %p1991_p0 }
   0xc   :  { %2001 = shalt.err (!%p1998_p4)
}
   0xd   :  { %s2112_s29 = smov 64   ;;  %s2113_s30 = smov 4  }
   0xe   :  { %39 = dma.hbm_to_vmem [thread:$0]  %s2244_s1, 1024, %s34_s25, [#allocation8], %s2112_s29, %s2112_s29, %s2113_s30  }
   0xf   :  { %s2010_s10 = scalar_lea.vmem %s60_s27, 128  ;;  %p2015_p6 = scmp.lt.s32.totalorder %s60_s27, %s60_s27 }
  0x10   :  { %p2011_p5 = scmp.ne.s32.totalorder %s60_s27, %s2010_s10  ;;  %p2016_p7 = scmp.lt.s32.totalorder %s2010_s10, %s2010_s10 }
  0x12   :  { %p2017_p8 = por %p2016_p7, %p2015_p6 }
  0x14   :  { %p2018_p9 = pnand %p2017_p8, %p2011_p5 }
  0x16   :  { %2021 = shalt.err (!%p2018_p9)
}
  0x17   :  { %65 = dma.hbm_to_vmem [thread:$0]  %s2247_s4, 128, %s60_s27, [#allocation11], %s2112_s29, %s2112_s29, %s2113_s30  }
  0x18   :  { %s2114_s13 = smov [#allocation4]   ;;  %s2115_s15 = smov [#allocation9]  }
  0x19   :  { %s21_s14 = sshll.u32 %s2114_s13, 4  ;;  %s45_s16 = sshll.u32 %s2115_s15, 4  ;;  %s22_s14 = int_to_ptr.vmem [resolvable:$true] %s21_s14  ;;  %s46_s16 = int_to_ptr.vmem [resolvable:$true] %s45_s16 }
  0x1a   :  { %s2030_s17 = scalar_lea.vmem %s22_s14, 1024  ;;  %p2035_p11 = scmp.lt.s32.totalorder %s22_s14, %s22_s14 }
  0x1b   :  { %p2031_p10 = scmp.ne.s32.totalorder %s22_s14, %s2030_s17  ;;  %p2036_p12 = scmp.lt.s32.totalorder %s2030_s17, %s2030_s17 }
  0x1d   :  { %p2037_p13 = por %p2036_p12, %p2035_p11 }
  0x1f   :  { %p2038_p0 = pnand %p2037_p13, %p2031_p10 }
  0x21   :  { %2041 = shalt.err (!%p2038_p0)
}
  0x22   :  { %27 = dma.hbm_to_vmem [thread:$0]  %s2243_s0, 1024, %s22_s14, [#allocation5], %s2112_s29, %s2112_s29, %s2113_s30  }
  0x23   :  { %s2050_s19 = scalar_lea.vmem %s46_s16, 4096  ;;  %p2055_p2 = scmp.lt.s32.totalorder %s46_s16, %s46_s16 }
  0x24   :  { %p2051_p1 = scmp.ne.s32.totalorder %s46_s16, %s2050_s19  ;;  %p2056_p3 = scmp.lt.s32.totalorder %s2050_s19, %s2050_s19 }
  0x26   :  { %p2057_p4 = por %p2056_p3, %p2055_p2 }
  0x28   :  { %p2058_p5 = pnand %p2057_p4, %p2051_p1 }
  0x2a   :  { %2061 = shalt.err (!%p2058_p5)
}
  0x2b   :  { %s2116_s4 = smov 128   ;;  %s2117_s20 = smov 8  }
  0x2c   :  { %51 = dma.hbm_to_vmem [thread:$0]  %s2245_s2, 4096, %s46_s16, [#allocation8], %s2116_s4, %s2116_s4, %s2117_s20  }
  0x2d   :  { %s2118_s23 = smov [#allocation12]  }
  0x2e   :  { %s71_s24 = sshll.u32 %s2118_s23, 4  ;;  %s72_s24 = int_to_ptr.vmem [resolvable:$true] %s71_s24 }
  0x2f   :  { %s2070_s0 = scalar_lea.vmem %s72_s24, 2048  ;;  %p2075_p7 = scmp.lt.s32.totalorder %s72_s24, %s72_s24 }
  0x30   :  { %p2071_p6 = scmp.ne.s32.totalorder %s72_s24, %s2070_s0  ;;  %p2076_p8 = scmp.lt.s32.totalorder %s2070_s0, %s2070_s0 }
  0x32   :  { %p2077_p9 = por %p2076_p8, %p2075_p7 }
  0x34   :  { %p2078_p10 = pnand %p2077_p9, %p2071_p6 }
  0x36   :  { %2081 = shalt.err (!%p2078_p10)
}
  0x37   :  { %77 = dma.hbm_to_vmem [thread:$0]  %s2248_s5, 2048, %s72_s24, [#allocation11], %s2116_s4, %s2116_s4, %s2117_s20  }
  0x38   :  { %2102 = dma.done.wait [#allocation5], 1024  }
  0x39   :  { %2103 = vsyncadd [#allocation5], 4294966272 }
  0x3a   :  { %2104 = dma.done.wait [#allocation8], 5120  }
  0x3b   :  { %2105 = vsyncadd [#allocation8], 4294962176 }
  0x3c   :  { %2106 = dma.done.wait [#allocation11], 2176  }
  0x3d   :  { %2107 = vsyncadd [#allocation11], 4294965120  ;;  %v1941_v0 = vld [vmem:[#allocation7 + $0x38] sm:$0xff]   ;;  %v1942_v1 = vld [vmem:[#allocation7 + $0x30] sm:$0xff]   ;;  %s2121_s30 = smov [#allocation13]  }
  0x3e   :  { %1698 = vmatprep.subr.bf16.mxu0 %v1941_v0  ;;  %v1943_v2 = vld [vmem:[#allocation7 + $0x28] sm:$0xff]   ;;  %v1944_v3 = vld [vmem:[#allocation7 + $0x20] sm:$0xff]   ;;  %v1945_v5 = vld [vmem:[#allocation7 + $0x18] sm:$0xff]   ;;  %s1358_s8 = sshll.u32 %s2121_s30, 4  ;;  %s1359_s8 = int_to_ptr.vmem [resolvable:$true] %s1358_s8 }
  0x3f   :  { %1699 = vmatpush3.bf16.msra.mxu0 %v1941_v0  ;;  %v1949_v4 = vld [vmem:[#allocation4] sm:$0xff]   ;;  %v1946_v6 = vld [vmem:[#allocation7 + $0x10] sm:$0xff]   ;;  %v336_v7 = vld [vmem:[#allocation9 + $0x78] sm:$0xff]  ;;  %s2082_s9 = scalar_lea.vmem %s1359_s8, 256  ;;  %p2087_p12 = scmp.lt.s32.totalorder %s1359_s8, %s1359_s8 }
  0x40   :  { %1700 = vmatprep.subr.bf16.mxu0 %v1942_v1  ;;  %1714 = vmatprep.mubr.bf16.mxu0 %v1949_v4  ;;  %v335_v8 = vld [vmem:[#allocation9 + $0x70] sm:$0xff]  ;;  %v334_v9 = vld [vmem:[#allocation9 + $0x68] sm:$0xff]  ;;  %v333_v11 = vld [vmem:[#allocation9 + $0x60] sm:$0xff]  ;;  %p2083_p11 = scmp.ne.s32.totalorder %s1359_s8, %s2082_s9  ;;  %p2088_p13 = scmp.lt.s32.totalorder %s2082_s9, %s2082_s9 }
  0x41   :  { %1730 = vmatprep.subr.mxu1 %v336_v7  ;;  %v1947_v10 = vld [vmem:[#allocation7 + $0x8] sm:$0xff]   ;;  %v332_v12 = vld [vmem:[#allocation9 + $0x58] sm:$0xff]  ;;  %v1948_v13 = vld [vmem:[#allocation7] sm:$0xff]  }
  0x42   :  { %1731 = vmatpush3.msra.mxu1 %v336_v7  ;;  %v331_v14 = vld [vmem:[#allocation9 + $0x50] sm:$0xff]  ;;  %v330_v15 = vld [vmem:[#allocation9 + $0x48] sm:$0xff]  ;;  %v329_v16 = vld [vmem:[#allocation9 + $0x40] sm:$0xff]  ;;  %p2089_p0 = por %p2088_p13, %p2087_p12 }
  0x43   :  { %1701 = vmatpush3.bf16.msra.mxu0 %v1942_v1  ;;  %1732 = vmatprep.subr.mxu1 %v335_v8  ;;  %v1950_v17 = vld [vmem:[#allocation4 + $0x8] sm:$0xff]   ;;  %v328_v18 = vld [vmem:[#allocation9 + $0x38] sm:$0xff]  ;;  %v1951_v19 = vld [vmem:[#allocation4 + $0x10] sm:$0xff]  }
  0x44   :  { %1702 = vmatprep.subr.bf16.mxu0 %v1943_v2  ;;  %1733 = vmatpush3.msra.mxu1 %v335_v8  ;;  %v327_v20 = vld [vmem:[#allocation9 + $0x30] sm:$0xff]  ;;  %v326_v21 = vld [vmem:[#allocation9 + $0x28] sm:$0xff]  ;;  %v325_v22 = vld [vmem:[#allocation9 + $0x20] sm:$0xff]  ;;  %p2090_p1 = pnand %p2089_p0, %p2083_p11 }
  0x45   :  { %1734 = vmatprep.subr.mxu1 %v334_v9  ;;  %v1952_v23 = vld [vmem:[#allocation4 + $0x18] sm:$0xff]   ;;  %v1953_v25 = vld [vmem:[#allocation4 + $0x20] sm:$0xff]   ;;  %v1954_v26 = vld [vmem:[#allocation4 + $0x28] sm:$0xff]  }
  0x46   :  { %1735 = vmatpush3.msra.mxu1 %v334_v9  ;;  %v324_v24 = vld [vmem:[#allocation9 + $0x18] sm:$0xff]  ;;  %v1955_v27 = vld [vmem:[#allocation4 + $0x30] sm:$0xff]   ;;  %v322_v30 = vld [vmem:[#allocation9 + $0x8] sm:$0xff] }
  0x47   :  { %1703 = vmatpush3.bf16.msra.mxu0 %v1943_v2  ;;  %1736 = vmatprep.subr.mxu1 %v333_v11  ;;  %v1956_v28 = vld [vmem:[#allocation4 + $0x38] sm:$0xff]   ;;  %v323_v29 = vld [vmem:[#allocation9 + $0x10] sm:$0xff]  ;;  %v321_v31 = vld [vmem:[#allocation9] sm:$0xff] }
  0x48   :  { %1704 = vmatprep.subr.bf16.mxu0 %v1944_v3  ;;  %1737 = vmatpush3.msra.mxu1 %v333_v11  ;;  %v1965_v48 = vld [vmem:[#allocation4] sm:$0xff]   ;;  %v858_v49 = vld [vmem:[#allocation9 + $0xf8] sm:$0xff]  ;;  %v857_v50 = vld [vmem:[#allocation9 + $0xf0] sm:$0xff] }
  0x49   :  { %1738 = vmatprep.subr.mxu1 %v332_v12  ;;  %v856_v51 = vld [vmem:[#allocation9 + $0xe8] sm:$0xff]  ;;  %v855_v52 = vld [vmem:[#allocation9 + $0xe0] sm:$0xff]  ;;  %v854_v53 = vld [vmem:[#allocation9 + $0xd8] sm:$0xff] }
  0x4a   :  { %1739 = vmatpush3.msra.mxu1 %v332_v12  ;;  %v853_v54 = vld [vmem:[#allocation9 + $0xd0] sm:$0xff]  ;;  %v852_v55 = vld [vmem:[#allocation9 + $0xc8] sm:$0xff]  ;;  %v851_v56 = vld [vmem:[#allocation9 + $0xc0] sm:$0xff] }
  0x4b   :  { %1705 = vmatpush3.bf16.msra.mxu0 %v1944_v3  ;;  %1740 = vmatprep.subr.mxu1 %v331_v14  ;;  %v850_v57 = vld [vmem:[#allocation9 + $0xb8] sm:$0xff]  ;;  %v849_v58 = vld [vmem:[#allocation9 + $0xb0] sm:$0xff]  ;;  %v848_v59 = vld [vmem:[#allocation9 + $0xa8] sm:$0xff] }
  0x4c   :  { %1706 = vmatprep.subr.bf16.mxu0 %v1945_v5  ;;  %1741 = vmatpush3.msra.mxu1 %v331_v14  ;;  %v847_v60 = vld [vmem:[#allocation9 + $0xa0] sm:$0xff]  ;;  %v846_v61 = vld [vmem:[#allocation9 + $0x98] sm:$0xff] }
  0x4d   :  { %1742 = vmatprep.subr.mxu1 %v330_v15  ;;  %v2186_v62 = vld [vmem:[%s2246_s3] ss:$0 sm:$0xff] }
  0x4e   :  { %1743 = vmatpush3.msra.mxu1 %v330_v15 }
  0x4f   :  { %1707 = vmatpush3.bf16.msra.mxu0 %v1945_v5  ;;  %1744 = vmatprep.subr.mxu1 %v329_v16 }
  0x50   :  { %1708 = vmatprep.subr.bf16.mxu0 %v1946_v6  ;;  %1745 = vmatpush3.msra.mxu1 %v329_v16 }
  0x51   :  { %1746 = vmatprep.subr.mxu1 %v328_v18 }
  0x52   :  { %1747 = vmatpush3.msra.mxu1 %v328_v18 }
  0x53   :  { %1709 = vmatpush3.bf16.msra.mxu0 %v1946_v6  ;;  %1748 = vmatprep.subr.mxu1 %v327_v20 }
  0x54   :  { %1710 = vmatprep.subr.bf16.mxu0 %v1947_v10  ;;  %1749 = vmatpush3.msra.mxu1 %v327_v20 }
  0x55   :  { %1750 = vmatprep.subr.mxu1 %v326_v21 }
  0x56   :  { %1751 = vmatpush3.msra.mxu1 %v326_v21 }
  0x57   :  { %1711 = vmatpush3.bf16.msra.mxu0 %v1947_v10  ;;  %1752 = vmatprep.subr.mxu1 %v325_v22 }
  0x58   :  { %1712 = vmatprep.subr.bf16.mxu0 %v1948_v13  ;;  %1753 = vmatpush3.msra.mxu1 %v325_v22 }
  0x59   :  { %1754 = vmatprep.subr.mxu1 %v324_v24 }
  0x5a   :  { %1755 = vmatpush3.msra.mxu1 %v324_v24 }
  0x5b   :  { %1713 = vmatpush3.bf16.msra.mxu0 %v1948_v13  ;;  %1756 = vmatprep.subr.mxu1 %v323_v29 }
  0x5c   :  { %1757 = vmatpush3.msra.mxu1 %v323_v29 }
  0x5d   :  { %1758 = vmatprep.subr.mxu1 %v322_v30 }
  0x5e   :  { %1715 = vmatmul.mubr.bf16.vlgmr.msra.gmra.mxu0 %v1950_v17  ;;  %1759 = vmatpush3.msra.mxu1 %v322_v30 }
  0x5f   :  { %1718 = vmatprep.mubr.bf16.mxu0 %v1951_v19  ;;  %1760 = vmatprep.subr.mxu1 %v321_v31 }
  0x60   :  { %1761 = vmatpush3.msra.mxu1 %v321_v31 }
  0x61   :  { %1818 = vmatprep.subr.mxu1 %v858_v49 }
  0x66   :  { %1719 = vmatmul.mubr.bf16.gmra.mxu0 %v1952_v23 }
  0x67   :  { %1722 = vmatprep.mubr.bf16.mxu0 %v1953_v25 }
  0x6e   :  { %1723 = vmatmul.mubr.bf16.gmra.mxu0 %v1954_v26 }
  0x6f   :  { %1726 = vmatprep.mubr.bf16.mxu0 %v1955_v27 }
  0x76   :  { %1727 = vmatmul.mubr.bf16.gmra.mxu0 %v1956_v28 }
  0x77   :  { %1802 = vmatprep.mubr.bf16.mxu0 %v1965_v48 }
 0x11e   :  { %v1716_v32 = vpop.f32.mrf.mxu0 }
 0x120   :  { %v258_v33 = vpop.f32.mrf.mxu0 }
 0x121   :  { %1762 = vmatprep.mubr.f32.mxu1 %v258_v33 }
 0x122   :  { %v1717_v34 = vpop.f32.mrf.mxu0 }
 0x124   :  { %v261_v35 = vpop.f32.mrf.mxu0 }
 0x125   :  { %1763 = vmatmul.mubr.f32.vlgmr.msra.gmra.mxu1 %v261_v35 }
 0x126   :  { %v1720_v36 = vpop.f32.mrf.mxu0  ;;  %1765 = vmatprep.mubr.f32.mxu1 %v1716_v32  ;;  %1819 = vmatpush3.msra.mxu1 %v858_v49 }
 0x127   :  { %1820 = vmatprep.subr.mxu1 %v857_v50 }
 0x128   :  { %v274_v37 = vpop.f32.mrf.mxu0  ;;  %1821 = vmatpush3.msra.mxu1 %v857_v50 }
 0x129   :  { %1766 = vmatmul.mubr.f32.gmra.mxu1 %v1717_v34  ;;  %1822 = vmatprep.subr.mxu1 %v856_v51 }
 0x12a   :  { %v1721_v38 = vpop.f32.mrf.mxu0  ;;  %1768 = vmatprep.mubr.f32.mxu1 %v274_v37  ;;  %1823 = vmatpush3.msra.mxu1 %v856_v51 }
 0x12b   :  { %1824 = vmatprep.subr.mxu1 %v855_v52 }
 0x12c   :  { %v277_v39 = vpop.f32.mrf.mxu0  ;;  %1825 = vmatpush3.msra.mxu1 %v855_v52 }
 0x12d   :  { %1769 = vmatmul.mubr.f32.gmra.mxu1 %v277_v39  ;;  %1826 = vmatprep.subr.mxu1 %v854_v53 }
 0x12e   :  { %v1724_v40 = vpop.f32.mrf.mxu0  ;;  %1771 = vmatprep.mubr.f32.mxu1 %v1720_v36  ;;  %1827 = vmatpush3.msra.mxu1 %v854_v53 }
 0x12f   :  { %1828 = vmatprep.subr.mxu1 %v853_v54 }
 0x130   :  { %v290_v41 = vpop.f32.mrf.mxu0  ;;  %1829 = vmatpush3.msra.mxu1 %v853_v54 }
 0x131   :  { %1772 = vmatmul.mubr.f32.gmra.mxu1 %v1721_v38  ;;  %1830 = vmatprep.subr.mxu1 %v852_v55 }
 0x132   :  { %v1725_v42 = vpop.f32.mrf.mxu0  ;;  %1774 = vmatprep.mubr.f32.mxu1 %v290_v41  ;;  %1831 = vmatpush3.msra.mxu1 %v852_v55 }
 0x133   :  { %1832 = vmatprep.subr.mxu1 %v851_v56 }
 0x134   :  { %v293_v43 = vpop.f32.mrf.mxu0  ;;  %1833 = vmatpush3.msra.mxu1 %v851_v56 }
 0x135   :  { %1775 = vmatmul.mubr.f32.gmra.mxu1 %v293_v43  ;;  %1834 = vmatprep.subr.mxu1 %v850_v57 }
 0x136   :  { %v1728_v44 = vpop.f32.mrf.mxu0  ;;  %1777 = vmatprep.mubr.f32.mxu1 %v1724_v40  ;;  %1835 = vmatpush3.msra.mxu1 %v850_v57 }
 0x137   :  { %1836 = vmatprep.subr.mxu1 %v849_v58 }
 0x138   :  { %v306_v45 = vpop.f32.mrf.mxu0  ;;  %1837 = vmatpush3.msra.mxu1 %v849_v58 }
 0x139   :  { %1778 = vmatmul.mubr.f32.gmra.mxu1 %v1725_v42  ;;  %1838 = vmatprep.subr.mxu1 %v848_v59 }
 0x13a   :  { %v1729_v46 = vpop.f32.mrf.mxu0  ;;  %1780 = vmatprep.mubr.f32.mxu1 %v306_v45  ;;  %1839 = vmatpush3.msra.mxu1 %v848_v59 }
 0x13b   :  { %1840 = vmatprep.subr.mxu1 %v847_v60 }
 0x13c   :  { %v309_v47 = vpop.f32.mrf.mxu0  ;;  %1841 = vmatpush3.msra.mxu1 %v847_v60 }
 0x13d   :  { %1781 = vmatmul.mubr.f32.gmra.mxu1 %v309_v47  ;;  %1842 = vmatprep.subr.mxu1 %v846_v61 }
 0x13e   :  { %1783 = vmatprep.mubr.f32.mxu1 %v1728_v44  ;;  %1843 = vmatpush3.msra.mxu1 %v846_v61 }
 0x141   :  { %1784 = vmatmul.mubr.f32.gmra.mxu1 %v1729_v46 }
 0x1e5   :  { %v1764_v63 = vpop.f32.mrf.mxu1 }
 0x1e6   :  { %v416_v0 = vadd.f32 %v1764_v63, %v2186_v62 }
 0x1e7   :  { %v410_v1 = vpop.f32.mrf.mxu1 }
 0x1e8   :  { %v506_v2 = vmul.f32 0.01, %v416_v0  ;;  %v411_v3 = vadd.f32 %v2186_v62, %v410_v1  ;;  %vm490_vm0 = vcmp.ge.f32.partialorder %v416_v0, 0.0 }
 0x1e9   :  { %v1767_v4 = vpop.f32.mrf.mxu1 }
 0x1ea   :  { %vm489_vm1 = vcmp.ge.f32.partialorder %v411_v3, 0.0  ;;  %v505_v5 = vmul.f32 0.01, %v411_v3  ;;  %v426_v6 = vadd.f32 %v1767_v4, %v2186_v62  ;;  %v522_v8 = vsel %vm490_vm0, %v416_v0, %v506_v2 }
 0x1eb   :  { %v420_v7 = vpop.f32.mrf.mxu1  ;;  %vm2120_vm0 = vmmov 0  }
 0x1ec   :  { %v521_v9 = vsel %vm489_vm1, %v411_v3, %v505_v5  ;;  %v508_v10 = vmul.f32 0.01, %v426_v6  ;;  %v421_v11 = vadd.f32 %v2186_v62, %v420_v7  ;;  %vm492_vm2 = vcmp.ge.f32.partialorder %v426_v6, 0.0 }
 0x1ed   :  { %v1484_v12 = vpack.c.bf16 %v522_v8, %v521_v9  ;;  %v1770_v13 = vpop.f32.mrf.mxu1 }
 0x1ee   :  { %vm491_vm3 = vcmp.ge.f32.partialorder %v421_v11, 0.0  ;;  %v507_v14 = vmul.f32 0.01, %v421_v11  ;;  %v436_v15 = vadd.f32 %v1770_v13, %v2186_v62  ;;  %v524_v17 = vsel %vm492_vm2, %v426_v6, %v508_v10 }
 0x1ef   :  { %1485 = vst [vmem:[#allocation2] sm:$0xff] %v1484_v12   ;;  %v430_v16 = vpop.f32.mrf.mxu1 }
 0x1f0   :  { %v523_v18 = vsel %vm491_vm3, %v421_v11, %v507_v14  ;;  %v510_v19 = vmul.f32 0.01, %v436_v15  ;;  %v431_v20 = vadd.f32 %v2186_v62, %v430_v16  ;;  %vm494_vm4 = vcmp.ge.f32.partialorder %v436_v15, 0.0  ;;  %v1967_v16 = vld [vmem:[#allocation4 + $0x10] sm:$0xff]  }
 0x1f1   :  { %v1489_v21 = vpack.c.bf16 %v524_v17, %v523_v18  ;;  %v1773_v22 = vpop.f32.mrf.mxu1  ;;  %v1968_v17 = vld [vmem:[#allocation4 + $0x18] sm:$0xff]   ;;  %v1969_v18 = vld [vmem:[#allocation4 + $0x20] sm:$0xff]  }
 0x1f2   :  { %vm493_vm5 = vcmp.ge.f32.partialorder %v431_v20, 0.0  ;;  %v509_v23 = vmul.f32 0.01, %v431_v20  ;;  %v446_v24 = vadd.f32 %v1773_v22, %v2186_v62  ;;  %v526_v26 = vsel %vm494_vm4, %v436_v15, %v510_v19  ;;  %v1966_v15 = vld [vmem:[#allocation4 + $0x8] sm:$0xff]   ;;  %v845_v22 = vld [vmem:[#allocation9 + $0x90] sm:$0xff] }
 0x1f3   :  { %1561 = vst [vmem:[#allocation2 + $0x8] sm:$0xff] %v1489_v21   ;;  %v440_v25 = vpop.f32.mrf.mxu1  ;;  %v1970_v19 = vld [vmem:[#allocation4 + $0x28] sm:$0xff]   ;;  %v1972_v21 = vld [vmem:[#allocation4 + $0x38] sm:$0xff]   ;;  %1844 = vmatprep.subr.mxu1 %v845_v22 }
 0x1f4   :  { %v525_v27 = vsel %vm493_vm5, %v431_v20, %v509_v23  ;;  %v512_v28 = vmul.f32 0.01, %v446_v24  ;;  %v441_v29 = vadd.f32 %v2186_v62, %v440_v25  ;;  %vm496_vm6 = vcmp.ge.f32.partialorder %v446_v24, 0.0  ;;  %v1971_v20 = vld [vmem:[#allocation4 + $0x30] sm:$0xff]   ;;  %1845 = vmatpush3.msra.mxu1 %v845_v22  ;;  %v844_v23 = vld [vmem:[#allocation9 + $0x88] sm:$0xff] }
 0x1f5   :  { %v1494_v30 = vpack.c.bf16 %v526_v26, %v525_v27  ;;  %v1776_v31 = vpop.f32.mrf.mxu1  ;;  %1846 = vmatprep.subr.mxu1 %v844_v23 }
 0x1f6   :  { %vm495_vm7 = vcmp.ge.f32.partialorder %v441_v29, 0.0  ;;  %v511_v32 = vmul.f32 0.01, %v441_v29  ;;  %v456_v33 = vadd.f32 %v1776_v31, %v2186_v62  ;;  %v528_v35 = vsel %vm496_vm6, %v446_v24, %v512_v28  ;;  %v1964_v14 = vld [vmem:[#allocation2] sm:$0xff]   ;;  %1847 = vmatpush3.msra.mxu1 %v844_v23 }
 0x1f7   :  { %1562 = vst [vmem:[#allocation2 + $0x10] sm:$0xff] %v1494_v30   ;;  %v450_v34 = vpop.f32.mrf.mxu1  ;;  %v843_v24 = vld [vmem:[#allocation9 + $0x80] sm:$0xff] }
 0x1f8   :  { %v527_v36 = vsel %vm495_vm7, %v441_v29, %v511_v32  ;;  %v514_v37 = vmul.f32 0.01, %v456_v33  ;;  %v451_v38 = vadd.f32 %v2186_v62, %v450_v34  ;;  %vm498_vm8 = vcmp.ge.f32.partialorder %v456_v33, 0.0  ;;  %1848 = vmatprep.subr.mxu1 %v843_v24 }
 0x1f9   :  { %v1499_v39 = vpack.c.bf16 %v528_v35, %v527_v36  ;;  %v1779_v40 = vpop.f32.mrf.mxu1  ;;  %1849 = vmatpush3.msra.mxu1 %v843_v24 }
 0x1fa   :  { %vm497_vm9 = vcmp.ge.f32.partialorder %v451_v38, 0.0  ;;  %v513_v41 = vmul.f32 0.01, %v451_v38  ;;  %v466_v42 = vadd.f32 %v1779_v40, %v2186_v62  ;;  %v530_v44 = vsel %vm498_vm8, %v456_v33, %v514_v37  ;;  %v1963_v13 = vld [vmem:[#allocation2 + $0x8] sm:$0xff]  }
 0x1fb   :  { %1563 = vst [vmem:[#allocation2 + $0x18] sm:$0xff] %v1499_v39   ;;  %v460_v43 = vpop.f32.mrf.mxu1 }
 0x1fc   :  { %v529_v45 = vsel %vm497_vm9, %v451_v38, %v513_v41  ;;  %v516_v46 = vmul.f32 0.01, %v466_v42  ;;  %v461_v47 = vadd.f32 %v2186_v62, %v460_v43  ;;  %vm500_vm10 = vcmp.ge.f32.partialorder %v466_v42, 0.0  ;;  %v1267_v43 = vld [vmem:[#allocation12 + $0x70] sm:$0xff] }
 0x1fd   :  { %v1504_v48 = vpack.c.bf16 %v530_v44, %v529_v45  ;;  %v1782_v49 = vpop.f32.mrf.mxu1  ;;  %v2119_v41 = vmov 0.0   ;;  %v1266_v44 = vld [vmem:[#allocation12 + $0x68] sm:$0xff]  ;;  %v1265_v45 = vld [vmem:[#allocation12 + $0x60] sm:$0xff] }
 0x1fe   :  { %vm499_vm11 = vcmp.ge.f32.partialorder %v461_v47, 0.0  ;;  %v515_v50 = vmul.f32 0.01, %v461_v47  ;;  %v476_v51 = vadd.f32 %v1782_v49, %v2186_v62  ;;  %v532_v53 = vsel %vm500_vm10, %v466_v42, %v516_v46  ;;  %v1962_v12 = vld [vmem:[#allocation2 + $0x10] sm:$0xff]   ;;  %v1268_v42 = vld [vmem:[#allocation12 + $0x78] sm:$0xff]  ;;  %v1261_v49 = vld [vmem:[#allocation12 + $0x40] sm:$0xff] }
 0x1ff   :  { %1564 = vst [vmem:[#allocation2 + $0x20] sm:$0xff] %v1504_v48   ;;  %v470_v52 = vpop.f32.mrf.mxu1  ;;  %1894 = vmatprep.subr.mxu1 %v1268_v42  ;;  %v1264_v46 = vld [vmem:[#allocation12 + $0x58] sm:$0xff]  ;;  %v1262_v48 = vld [vmem:[#allocation12 + $0x48] sm:$0xff] }
 0x200   :  { %v531_v54 = vsel %vm499_vm11, %v461_v47, %v515_v50  ;;  %v518_v55 = vmul.f32 0.01, %v476_v51  ;;  %v471_v56 = vadd.f32 %v2186_v62, %v470_v52  ;;  %vm502_vm12 = vcmp.ge.f32.partialorder %v476_v51, 0.0  ;;  %v1263_v47 = vld [vmem:[#allocation12 + $0x50] sm:$0xff]  ;;  %v1260_v50 = vld [vmem:[#allocation12 + $0x38] sm:$0xff]  ;;  %v1258_v52 = vld [vmem:[#allocation12 + $0x28] sm:$0xff] }
 0x201   :  { %v1509_v57 = vpack.c.bf16 %v532_v53, %v531_v54  ;;  %v1785_v58 = vpop.f32.mrf.mxu1  ;;  %v1257_v53 = vld [vmem:[#allocation12 + $0x20] sm:$0xff]  ;;  %v1256_v54 = vld [vmem:[#allocation12 + $0x18] sm:$0xff] }
 0x202   :  { %vm501_vm13 = vcmp.ge.f32.partialorder %v471_v56, 0.0  ;;  %v517_v59 = vmul.f32 0.01, %v471_v56  ;;  %v486_v60 = vadd.f32 %v1785_v58, %v2186_v62  ;;  %v534_v63 = vsel %vm502_vm12, %v476_v51, %v518_v55  ;;  %v1259_v51 = vld [vmem:[#allocation12 + $0x30] sm:$0xff] }
 0x203   :  { %1565 = vst [vmem:[#allocation2 + $0x28] sm:$0xff] %v1509_v57   ;;  %v480_v61 = vpop.f32.mrf.mxu1  ;;  %v1255_v55 = vld [vmem:[#allocation12 + $0x10] sm:$0xff] }
 0x204   :  { %v533_v0 = vsel %vm501_vm13, %v471_v56, %v517_v59  ;;  %v520_v1 = vmul.f32 0.01, %v486_v60  ;;  %v481_v2 = vadd.f32 %v2186_v62, %v480_v61  ;;  %vm504_vm14 = vcmp.ge.f32.partialorder %v486_v60, 0.0  ;;  %v1961_v62 = vld [vmem:[#allocation2 + $0x18] sm:$0xff]   ;;  %v2209_v56 = vld [vmem:[%s2246_s3 + $0x1] ss:$0 sm:$0xff] }
 0x205   :  { %v1514_v3 = vpack.c.bf16 %v534_v63, %v533_v0 }
 0x206   :  { %vm503_vm15 = vcmp.ge.f32.partialorder %v481_v2, 0.0  ;;  %v519_v4 = vmul.f32 0.01, %v481_v2  ;;  %v536_v5 = vsel %vm504_vm14, %v486_v60, %v520_v1  ;;  %v1960_v11 = vld [vmem:[#allocation2 + $0x20] sm:$0xff]  }
 0x207   :  { %1566 = vst [vmem:[#allocation2 + $0x30] sm:$0xff] %v1514_v3  }
 0x208   :  { %v535_v6 = vsel %vm503_vm15, %v481_v2, %v519_v4 }
 0x209   :  { %v1519_v7 = vpack.c.bf16 %v536_v5, %v535_v6 }
 0x20a   :  { %v1959_v10 = vld [vmem:[#allocation2 + $0x28] sm:$0xff]  }
 0x20b   :  { %1567 = vst [vmem:[#allocation2 + $0x38] sm:$0xff] %v1519_v7  }
 0x20e   :  { %v1958_v9 = vld [vmem:[#allocation2 + $0x30] sm:$0xff]  }
 0x212   :  { %v1957_v8 = vld [vmem:[#allocation2 + $0x38] sm:$0xff]  }
 0x213   :  { %1786 = vmatprep.subr.bf16.mxu0 %v1957_v8 }
 0x214   :  { %1787 = vmatpush3.bf16.msra.mxu0 %v1957_v8 }
 0x215   :  { %1788 = vmatprep.subr.bf16.mxu0 %v1958_v9 }
 0x218   :  { %1789 = vmatpush3.bf16.msra.mxu0 %v1958_v9 }
 0x219   :  { %1790 = vmatprep.subr.bf16.mxu0 %v1959_v10 }
 0x21c   :  { %1791 = vmatpush3.bf16.msra.mxu0 %v1959_v10 }
 0x21d   :  { %1792 = vmatprep.subr.bf16.mxu0 %v1960_v11 }
 0x220   :  { %1793 = vmatpush3.bf16.msra.mxu0 %v1960_v11 }
 0x221   :  { %1794 = vmatprep.subr.bf16.mxu0 %v1961_v62 }
 0x224   :  { %1795 = vmatpush3.bf16.msra.mxu0 %v1961_v62 }
 0x225   :  { %1796 = vmatprep.subr.bf16.mxu0 %v1962_v12 }
 0x228   :  { %1797 = vmatpush3.bf16.msra.mxu0 %v1962_v12 }
 0x229   :  { %1798 = vmatprep.subr.bf16.mxu0 %v1963_v13 }
 0x22c   :  { %1799 = vmatpush3.bf16.msra.mxu0 %v1963_v13 }
 0x22d   :  { %1800 = vmatprep.subr.bf16.mxu0 %v1964_v14 }
 0x230   :  { %1801 = vmatpush3.bf16.msra.mxu0 %v1964_v14 }
 0x231   :  { %1874 = vmatprep.subr.bf16.mxu0 %v2119_v41 }
 0x233   :  { %1803 = vmatmul.mubr.bf16.vlgmr.msra.gmra.mxu0 %v1966_v15 }
 0x234   :  { %1806 = vmatprep.mubr.bf16.mxu0 %v1967_v16 }
 0x23b   :  { %1807 = vmatmul.mubr.bf16.gmra.mxu0 %v1968_v17 }
 0x23c   :  { %1810 = vmatprep.mubr.bf16.mxu0 %v1969_v18 }
 0x243   :  { %1811 = vmatmul.mubr.bf16.gmra.mxu0 %v1970_v19 }
 0x244   :  { %1814 = vmatprep.mubr.bf16.mxu0 %v1971_v20 }
 0x24b   :  { %1815 = vmatmul.mubr.bf16.gmra.mxu0 %v1972_v21 }
 0x24c   :  { %1890 = vmatprep.mubr.msk.bf16.mxu0 %vm2120_vm0, %v2119_v41 }
 0x2f3   :  { %v1804_v25 = vpop.f32.mrf.mxu0 }
 0x2f5   :  { %v779_v26 = vpop.f32.mrf.mxu0 }
 0x2f6   :  { %1850 = vmatprep.mubr.f32.mxu1 %v779_v26 }
 0x2f7   :  { %v1805_v27 = vpop.f32.mrf.mxu0 }
 0x2f9   :  { %v782_v28 = vpop.f32.mrf.mxu0 }
 0x2fa   :  { %1851 = vmatmul.mubr.f32.vlgmr.msra.gmra.mxu1 %v782_v28 }
 0x2fb   :  { %v1808_v29 = vpop.f32.mrf.mxu0  ;;  %1853 = vmatprep.mubr.f32.mxu1 %v1804_v25  ;;  %1895 = vmatpush3.msra.mxu1 %v1268_v42 }
 0x2fc   :  { %1896 = vmatprep.subr.mxu1 %v1267_v43 }
 0x2fd   :  { %v795_v30 = vpop.f32.mrf.mxu0  ;;  %1897 = vmatpush3.msra.mxu1 %v1267_v43 }
 0x2fe   :  { %1854 = vmatmul.mubr.f32.gmra.mxu1 %v1805_v27  ;;  %1898 = vmatprep.subr.mxu1 %v1266_v44 }
 0x2ff   :  { %v1809_v31 = vpop.f32.mrf.mxu0  ;;  %1856 = vmatprep.mubr.f32.mxu1 %v795_v30  ;;  %1899 = vmatpush3.msra.mxu1 %v1266_v44 }
 0x300   :  { %1900 = vmatprep.subr.mxu1 %v1265_v45 }
 0x301   :  { %v798_v32 = vpop.f32.mrf.mxu0  ;;  %1901 = vmatpush3.msra.mxu1 %v1265_v45 }
 0x302   :  { %1857 = vmatmul.mubr.f32.gmra.mxu1 %v798_v32  ;;  %1902 = vmatprep.subr.mxu1 %v1264_v46 }
 0x303   :  { %v1812_v33 = vpop.f32.mrf.mxu0  ;;  %1859 = vmatprep.mubr.f32.mxu1 %v1808_v29  ;;  %1903 = vmatpush3.msra.mxu1 %v1264_v46 }
 0x304   :  { %1904 = vmatprep.subr.mxu1 %v1263_v47 }
 0x305   :  { %v811_v34 = vpop.f32.mrf.mxu0  ;;  %1905 = vmatpush3.msra.mxu1 %v1263_v47 }
 0x306   :  { %1860 = vmatmul.mubr.f32.gmra.mxu1 %v1809_v31  ;;  %1906 = vmatprep.subr.mxu1 %v1262_v48 }
 0x307   :  { %v1813_v35 = vpop.f32.mrf.mxu0  ;;  %1862 = vmatprep.mubr.f32.mxu1 %v811_v34  ;;  %1907 = vmatpush3.msra.mxu1 %v1262_v48 }
 0x308   :  { %1908 = vmatprep.subr.mxu1 %v1261_v49 }
 0x309   :  { %v814_v36 = vpop.f32.mrf.mxu0  ;;  %1909 = vmatpush3.msra.mxu1 %v1261_v49 }
 0x30a   :  { %1863 = vmatmul.mubr.f32.gmra.mxu1 %v814_v36  ;;  %1910 = vmatprep.subr.mxu1 %v1260_v50 }
 0x30b   :  { %v1816_v37 = vpop.f32.mrf.mxu0  ;;  %1865 = vmatprep.mubr.f32.mxu1 %v1812_v33  ;;  %1911 = vmatpush3.msra.mxu1 %v1260_v50 }
 0x30c   :  { %1912 = vmatprep.subr.mxu1 %v1259_v51 }
 0x30d   :  { %v827_v38 = vpop.f32.mrf.mxu0  ;;  %1913 = vmatpush3.msra.mxu1 %v1259_v51 }
 0x30e   :  { %1866 = vmatmul.mubr.f32.gmra.mxu1 %v1813_v35  ;;  %1914 = vmatprep.subr.mxu1 %v1258_v52 }
 0x30f   :  { %v1817_v39 = vpop.f32.mrf.mxu0  ;;  %1868 = vmatprep.mubr.f32.mxu1 %v827_v38  ;;  %1915 = vmatpush3.msra.mxu1 %v1258_v52 }
 0x310   :  { %1916 = vmatprep.subr.mxu1 %v1257_v53 }
 0x311   :  { %v830_v40 = vpop.f32.mrf.mxu0  ;;  %1917 = vmatpush3.msra.mxu1 %v1257_v53 }
 0x312   :  { %1869 = vmatmul.mubr.f32.gmra.mxu1 %v830_v40  ;;  %1918 = vmatprep.subr.mxu1 %v1256_v54 }
 0x313   :  { %1871 = vmatprep.mubr.f32.mxu1 %v1816_v37  ;;  %1919 = vmatpush3.msra.mxu1 %v1256_v54 }
 0x314   :  { %1920 = vmatprep.subr.mxu1 %v1255_v55 }
 0x315   :  { %1921 = vmatpush3.msra.mxu1 %v1255_v55 }
 0x316   :  { %1872 = vmatmul.mubr.f32.gmra.mxu1 %v1817_v39 }
 0x3ba   :  { %v1852_v57 = vpop.f32.mrf.mxu1 }
 0x3bb   :  { %v939_v58 = vadd.f32 %v1852_v57, %v2209_v56 }
 0x3bc   :  { %v933_v59 = vpop.f32.mrf.mxu1 }
 0x3bd   :  { %v1029_v60 = vmul.f32 0.01, %v939_v58  ;;  %v934_v61 = vadd.f32 %v2209_v56, %v933_v59  ;;  %vm1013_vm1 = vcmp.ge.f32.partialorder %v939_v58, 0.0 }
 0x3be   :  { %v1855_v63 = vpop.f32.mrf.mxu1 }
 0x3bf   :  { %vm1012_vm2 = vcmp.ge.f32.partialorder %v934_v61, 0.0  ;;  %v1028_v0 = vmul.f32 0.01, %v934_v61  ;;  %v949_v1 = vadd.f32 %v1855_v63, %v2209_v56  ;;  %v1045_v3 = vsel %vm1013_vm1, %v939_v58, %v1029_v60 }
 0x3c0   :  { %v943_v2 = vpop.f32.mrf.mxu1 }
 0x3c1   :  { %v1044_v4 = vsel %vm1012_vm2, %v934_v61, %v1028_v0  ;;  %v1031_v5 = vmul.f32 0.01, %v949_v1  ;;  %v944_v6 = vadd.f32 %v2209_v56, %v943_v2  ;;  %vm1015_vm3 = vcmp.ge.f32.partialorder %v949_v1, 0.0 }
 0x3c2   :  { %v1524_v7 = vpack.c.bf16 %v1045_v3, %v1044_v4  ;;  %v1858_v8 = vpop.f32.mrf.mxu1 }
 0x3c3   :  { %vm1014_vm4 = vcmp.ge.f32.partialorder %v944_v6, 0.0  ;;  %v1030_v9 = vmul.f32 0.01, %v944_v6  ;;  %v959_v10 = vadd.f32 %v1858_v8, %v2209_v56  ;;  %v1047_v62 = vsel %vm1015_vm3, %v949_v1, %v1031_v5 }
 0x3c4   :  { %1525 = vst [vmem:[#allocation3] sm:$0xff] %v1524_v7   ;;  %v953_v11 = vpop.f32.mrf.mxu1 }
 0x3c5   :  { %v1046_v12 = vsel %vm1014_vm4, %v944_v6, %v1030_v9  ;;  %v1033_v13 = vmul.f32 0.01, %v959_v10  ;;  %v954_v14 = vadd.f32 %v2209_v56, %v953_v11  ;;  %vm1017_vm5 = vcmp.ge.f32.partialorder %v959_v10, 0.0  ;;  %v1981_v11 = vld [vmem:[#allocation10] sm:$0xff]  }
 0x3c6   :  { %v1529_v15 = vpack.c.bf16 %v1047_v62, %v1046_v12  ;;  %v1861_v16 = vpop.f32.mrf.mxu1  ;;  %v1254_v62 = vld [vmem:[#allocation12 + $0x8] sm:$0xff]  ;;  %v1253_v12 = vld [vmem:[#allocation12] sm:$0xff] }
 0x3c7   :  { %vm1016_vm6 = vcmp.ge.f32.partialorder %v954_v14, 0.0  ;;  %v1032_v17 = vmul.f32 0.01, %v954_v14  ;;  %v969_v18 = vadd.f32 %v1861_v16, %v2209_v56  ;;  %v1049_v20 = vsel %vm1017_vm5, %v959_v10, %v1033_v13  ;;  %1922 = vmatprep.subr.mxu1 %v1254_v62 }
 0x3c8   :  { %1568 = vst [vmem:[#allocation3 + $0x8] sm:$0xff] %v1529_v15   ;;  %v963_v19 = vpop.f32.mrf.mxu1  ;;  %1923 = vmatpush3.msra.mxu1 %v1254_v62 }
 0x3c9   :  { %v1048_v21 = vsel %vm1016_vm6, %v954_v14, %v1032_v17  ;;  %v1035_v22 = vmul.f32 0.01, %v969_v18  ;;  %v964_v23 = vadd.f32 %v2209_v56, %v963_v19  ;;  %vm1019_vm7 = vcmp.ge.f32.partialorder %v969_v18, 0.0  ;;  %1924 = vmatprep.subr.mxu1 %v1253_v12 }
 0x3ca   :  { %v1534_v24 = vpack.c.bf16 %v1049_v20, %v1048_v21  ;;  %v1864_v25 = vpop.f32.mrf.mxu1  ;;  %1925 = vmatpush3.msra.mxu1 %v1253_v12 }
 0x3cb   :  { %vm1018_vm8 = vcmp.ge.f32.partialorder %v964_v23, 0.0  ;;  %v1034_v26 = vmul.f32 0.01, %v964_v23  ;;  %v979_v27 = vadd.f32 %v1864_v25, %v2209_v56  ;;  %v1051_v29 = vsel %vm1019_vm7, %v969_v18, %v1035_v22  ;;  %v1980_v10 = vld [vmem:[#allocation3] sm:$0xff]  }
 0x3cc   :  { %1569 = vst [vmem:[#allocation3 + $0x10] sm:$0xff] %v1534_v24   ;;  %v973_v28 = vpop.f32.mrf.mxu1 }
 0x3cd   :  { %v1050_v30 = vsel %vm1018_vm8, %v964_v23, %v1034_v26  ;;  %v1037_v31 = vmul.f32 0.01, %v979_v27  ;;  %v974_v32 = vadd.f32 %v2209_v56, %v973_v28  ;;  %vm1021_vm9 = vcmp.ge.f32.partialorder %v979_v27, 0.0 }
 0x3ce   :  { %v1539_v33 = vpack.c.bf16 %v1051_v29, %v1050_v30  ;;  %v1867_v34 = vpop.f32.mrf.mxu1 }
 0x3cf   :  { %vm1020_vm10 = vcmp.ge.f32.partialorder %v974_v32, 0.0  ;;  %v1036_v35 = vmul.f32 0.01, %v974_v32  ;;  %v989_v36 = vadd.f32 %v1867_v34, %v2209_v56  ;;  %v1053_v38 = vsel %vm1021_vm9, %v979_v27, %v1037_v31  ;;  %v1979_v9 = vld [vmem:[#allocation3 + $0x8] sm:$0xff]  }
 0x3d0   :  { %1570 = vst [vmem:[#allocation3 + $0x18] sm:$0xff] %v1539_v33   ;;  %v983_v37 = vpop.f32.mrf.mxu1 }
 0x3d1   :  { %v1052_v39 = vsel %vm1020_vm10, %v974_v32, %v1036_v35  ;;  %v1039_v40 = vmul.f32 0.01, %v989_v36  ;;  %v984_v42 = vadd.f32 %v2209_v56, %v983_v37  ;;  %vm1023_vm11 = vcmp.ge.f32.partialorder %v989_v36, 0.0 }
 0x3d2   :  { %v1544_v43 = vpack.c.bf16 %v1053_v38, %v1052_v39  ;;  %v1870_v44 = vpop.f32.mrf.mxu1 }
 0x3d3   :  { %vm1022_vm12 = vcmp.ge.f32.partialorder %v984_v42, 0.0  ;;  %v1038_v45 = vmul.f32 0.01, %v984_v42  ;;  %v999_v46 = vadd.f32 %v1870_v44, %v2209_v56  ;;  %v1055_v48 = vsel %vm1023_vm11, %v989_v36, %v1039_v40  ;;  %v1978_v8 = vld [vmem:[#allocation3 + $0x10] sm:$0xff]  }
 0x3d4   :  { %1571 = vst [vmem:[#allocation3 + $0x20] sm:$0xff] %v1544_v43   ;;  %v993_v47 = vpop.f32.mrf.mxu1 }
 0x3d5   :  { %v1054_v49 = vsel %vm1022_vm12, %v984_v42, %v1038_v45  ;;  %v1041_v50 = vmul.f32 0.01, %v999_v46  ;;  %v994_v51 = vadd.f32 %v2209_v56, %v993_v47  ;;  %vm1025_vm13 = vcmp.ge.f32.partialorder %v999_v46, 0.0 }
 0x3d6   :  { %v1549_v52 = vpack.c.bf16 %v1055_v48, %v1054_v49  ;;  %v1873_v53 = vpop.f32.mrf.mxu1 }
 0x3d7   :  { %vm1024_vm14 = vcmp.ge.f32.partialorder %v994_v51, 0.0  ;;  %v1040_v54 = vmul.f32 0.01, %v994_v51  ;;  %v1009_v55 = vadd.f32 %v1873_v53, %v2209_v56  ;;  %v1057_v58 = vsel %vm1025_vm13, %v999_v46, %v1041_v50  ;;  %v1977_v7 = vld [vmem:[#allocation3 + $0x18] sm:$0xff]  }
 0x3d8   :  { %1572 = vst [vmem:[#allocation3 + $0x28] sm:$0xff] %v1549_v52   ;;  %v1003_v57 = vpop.f32.mrf.mxu1 }
 0x3d9   :  { %v1056_v59 = vsel %vm1024_vm14, %v994_v51, %v1040_v54  ;;  %v1043_v60 = vmul.f32 0.01, %v1009_v55  ;;  %v1004_v61 = vadd.f32 %v2209_v56, %v1003_v57  ;;  %vm1027_vm15 = vcmp.ge.f32.partialorder %v1009_v55, 0.0 }
 0x3da   :  { %v1554_v63 = vpack.c.bf16 %v1057_v58, %v1056_v59 }
 0x3db   :  { %vm1026_vm0 = vcmp.ge.f32.partialorder %v1004_v61, 0.0  ;;  %v1042_v0 = vmul.f32 0.01, %v1004_v61  ;;  %v1059_v1 = vsel %vm1027_vm15, %v1009_v55, %v1043_v60  ;;  %v1976_v56 = vld [vmem:[#allocation3 + $0x20] sm:$0xff]  }
 0x3dc   :  { %1573 = vst [vmem:[#allocation3 + $0x30] sm:$0xff] %v1554_v63  }
 0x3dd   :  { %v1058_v2 = vsel %vm1026_vm0, %v1004_v61, %v1042_v0 }
 0x3de   :  { %v1559_v3 = vpack.c.bf16 %v1059_v1, %v1058_v2 }
 0x3df   :  { %v1975_v6 = vld [vmem:[#allocation3 + $0x28] sm:$0xff]  }
 0x3e0   :  { %1574 = vst [vmem:[#allocation3 + $0x38] sm:$0xff] %v1559_v3  }
 0x3e3   :  { %v1974_v5 = vld [vmem:[#allocation3 + $0x30] sm:$0xff]  }
 0x3e7   :  { %v1973_v4 = vld [vmem:[#allocation3 + $0x38] sm:$0xff]  }
 0x3e8   :  { %1875 = vmatpush3.bf16.msra.mxu0 %v1973_v4 }
 0x3e9   :  { %1876 = vmatprep.subr.bf16.mxu0 %v2119_v41 }
 0x3ec   :  { %1877 = vmatpush3.bf16.msra.mxu0 %v1974_v5 }
 0x3ed   :  { %1878 = vmatprep.subr.bf16.mxu0 %v2119_v41 }
 0x3f0   :  { %1879 = vmatpush3.bf16.msra.mxu0 %v1975_v6 }
 0x3f1   :  { %1880 = vmatprep.subr.bf16.mxu0 %v2119_v41 }
 0x3f4   :  { %1881 = vmatpush3.bf16.msra.mxu0 %v1976_v56 }
 0x3f5   :  { %1882 = vmatprep.subr.bf16.mxu0 %v2119_v41 }
 0x3f8   :  { %1883 = vmatpush3.bf16.msra.mxu0 %v1977_v7 }
 0x3f9   :  { %1884 = vmatprep.subr.bf16.mxu0 %v2119_v41 }
 0x3fc   :  { %1885 = vmatpush3.bf16.msra.mxu0 %v1978_v8 }
 0x3fd   :  { %1886 = vmatprep.subr.bf16.mxu0 %v2119_v41 }
 0x400   :  { %1887 = vmatpush3.bf16.msra.mxu0 %v1979_v9 }
 0x401   :  { %1888 = vmatprep.subr.bf16.mxu0 %v2119_v41  ;;  %v1448_v41 = vld [vmem:[%s2249_s6] ss:$0 sm:$0xff] }
 0x404   :  { %1889 = vmatpush3.bf16.msra.mxu0 %v1980_v10 }
 0x407   :  { %1891 = vmatmul.mubr.bf16.vlgmr.msra.gmra.mxu0 %v1981_v11 }
 0x4c7   :  { %v1246_v13 = vpop.f32.mrf.mxu0 }
 0x4c8   :  { %1926 = vmatprep.mubr.f32.mxu1 %v1246_v13 }
 0x4c9   :  { %v1892_v14 = vpop.f32.mrf.mxu0 }
 0x4cb   :  { %v1249_v15 = vpop.f32.mrf.mxu0 }
 0x4cc   :  { %1927 = vmatmul.mubr.f32.vlgmr.msra.gmra.mxu1 %v1249_v15 }
 0x4cd   :  { %v1893_v16 = vpop.f32.mrf.mxu0 }
 0x58c   :  { %v1928_v17 = vpop.f32.mrf.mxu1 }
 0x58d   :  { %v1348_v18 = vadd.f32 %v1928_v17, %v1448_v41 }
 0x58e   :  { %v1342_v19 = vpop.f32.mrf.mxu1 }
 0x58f   :  { %1352 = vst [vmem:[#allocation13 + $0x8] sm:$0xff] %v1348_v18  ;;  %v1343_v20 = vadd.f32 %v1448_v41, %v1342_v19 }
 0x591   :  { %1351 = vst [vmem:[#allocation13] sm:$0xff] %v1343_v20 }
 0x592   :  { %2093 = shalt.err (!%p2090_p1)
}
 0x593   :  { %1364 = dma.vmem_to_hbm [thread:$0]  %s1359_s8, 256, %s2250_s7, [#allocation6], %s2116_s4, %s2116_s4, %s2117_s20  }
 0x594   :  { %2108 = dma.done.wait [#allocation6], 256  }
 0x595   :  { %2109 = vsyncadd [#allocation6], 4294967040 }
 0x596   :  { %1368 = vsyncpa [#allocation5], 1 }
 0x597   :  { %1369 = vsyncpa [#allocation8], 1 }
 0x598   :  { %1370 = vsyncpa [#allocation11], 1 }
 0x599   :  { %1371 = vsyncpa [#allocation6], 1 }

</bundles_post_ra>
